<compile_context>
chip_gen: v6e
topology: v6e:2x2x1
jax: 0.10.0
libtpu: 0.0.40
codegen_flags: <defaults>
</compile_context>

<pallas_src>
import jax
import jax.numpy as jnp
from jax.experimental import pallas as pl
from jax.experimental.pallas import tpu as pltpu


# ---------------------------------------------------------------------------
# Kernel 1: tiled matmul for the time-parallel input projection
#           (T*B, IN) @ (IN, N) -> (T*B, N) f32
# ---------------------------------------------------------------------------
def _matmul_kernel(a_ref, b_ref, o_ref, acc_ref):
    @pl.when(pl.program_id(2) == 0)
    def _():
        acc_ref[...] = jnp.zeros_like(acc_ref)

    acc_ref[...] += jnp.dot(a_ref[...], b_ref[...],
                            preferred_element_type=jnp.float32)

    @pl.when(pl.program_id(2) == pl.num_programs(2) - 1)
    def _():
        o_ref[...] = acc_ref[...].astype(o_ref.dtype)


def _pick_tile(dim, candidates):
    for t in candidates:
        if dim % t == 0:
            return t
    return dim


def input_projection(x2d, wt):
    """x2d (M, K) bf16 @ wt (K, N) bf16 -> (M, N) f32 via a Pallas tiled matmul."""
    M, K = x2d.shape
    _, N = wt.shape
    tm = _pick_tile(M, (256, 128, 64, 32, 16, 8))
    tn = _pick_tile(N, (256, 128))
    tk = _pick_tile(K, (512, 256, 128))
    grid = (M // tm, N // tn, K // tk)
    return pl.pallas_call(
        _matmul_kernel,
        out_shape=jax.ShapeDtypeStruct((M, N), jnp.float32),
        grid=grid,
        in_specs=[pl.BlockSpec((tm, tk), lambda i, j, k: (i, k)),
                  pl.BlockSpec((tk, tn), lambda i, j, k: (k, j))],
        out_specs=pl.BlockSpec((tm, tn), lambda i, j, k: (i, j)),
        scratch_shapes=[pltpu.VMEM((tm, tn), jnp.float32)],
        compiler_params=pltpu.CompilerParams(
            dimension_semantics=("parallel", "parallel", "arbitrary")),
    )(x2d, wt)


# ---------------------------------------------------------------------------
# Kernel 2: sequential EFAdLIF recurrence.
#   grid = (n_batch_tiles ["parallel"], T ["arbitrary"])
#   State (u, z, w1, w2) is carried across the time axis in the state outputs,
#   whose block index is constant over t (resident-accumulator pattern).
#   Per step: soma = precomputed input projection + z_{t-1} @ R.T, then the
#   elementwise neuron update.
# ---------------------------------------------------------------------------
def efadlif_recurrence_kernel(thr_ref,                       # SMEM (1,1) f32
                              soma_ref,                      # (TB, N) f32 (timestep t)
                              rec_ref,                       # (N, N)  bf16, resident
                              p_ref,                         # (8, N)  f32 packed coeffs
                              u0_ref, z0_ref, w10_ref, w20_ref,   # (TB, N) f32 init
                              z_seq_ref,                     # (TB, N) f32 -> slot t
                              u_st_ref, z_st_ref, w1_st_ref, w2_st_ref):  # carried
    t = pl.program_id(1)

    # Initialize carried state from the provided initial state at t == 0
    # (also re-runs when the batch-tile ("parallel") index advances).
    @pl.when(t == 0)
    def _init():
        u_st_ref[...] = u0_ref[...]
        z_st_ref[...] = z0_ref[...]
        w1_st_ref[...] = w10_ref[...]
        w2_st_ref[...] = w20_ref[...]

    thr = thr_ref[0, 0]

    # Packed per-neuron coefficient rows, each (1, N) -> broadcast over batch.
    decay_u = p_ref[0:1, :]
    bias_eff = p_ref[1:2, :]        # (1 - decay_u) * bias
    decay_w1 = p_ref[2:3, :]
    c1a = p_ref[3:4, :]             # (1 - decay_w1) * a1 * q
    c1b = p_ref[4:5, :]             # (1 - decay_w1) * b1 * q
    decay_w2 = p_ref[5:6, :]
    c2a = p_ref[6:7, :]             # (1 - decay_w2) * a2 * q
    c2b = p_ref[7:8, :]             # (1 - decay_w2) * b2 * q

    u_tm1 = u_st_ref[...]
    z_tm1 = z_st_ref[...]
    w_tm1 = w1_st_ref[...]
    w_tm2 = w2_st_ref[...]

    rec = rec_ref[...]
    # soma = (x @ W1.T)  [precomputed, streamed]  +  z_{t-1} @ R.T
    soma = soma_ref[...] + jnp.dot(z_tm1.astype(rec.dtype), rec,
                                   preferred_element_type=jnp.float32)

    u_t = decay_u * u_tm1 + (1.0 - decay_u) * (soma - w_tm1 - w_tm2) + bias_eff
    # heaviside(u_t - thr, 0): 1 where > 0 else 0 (forward value of surrogate spike)
    z_t = (u_t - thr > 0.0).astype(jnp.float32)
    u_t = u_t * (1.0 - z_t)

    w_t1 = decay_w1 * w_tm1 + c1a * u_tm1 + c1b * z_tm1
    # NOTE: intentionally decays w_tm1 (not w_tm2), matching the PyTorch source.
    w_t2 = decay_w2 * w_tm1 + c2a * u_tm1 + c2b * z_tm1

    z_seq_ref[...] = z_t
    u_st_ref[...] = u_t
    z_st_ref[...] = z_t
    w1_st_ref[...] = w_t1
    w2_st_ref[...] = w_t2


# ---------------------------------------------------------------------------
# Parameter preparation (one-time, plain JAX): transpose weights, cast to the
# MXU compute dtype, fold bias/q into per-neuron coefficients, pack into (8, N).
# ---------------------------------------------------------------------------
def prepare_params(params, *, q, compute_dtype=jnp.bfloat16):
    wt = params["weight_1"].T.astype(compute_dtype)     # (IN, N)
    rec = params["recurrent"].T.astype(compute_dtype)   # (N, N)
    q = jnp.float32(q)
    du = params["decay_u"].astype(jnp.float32)
    dw1 = params["decay_w1"].astype(jnp.float32)
    dw2 = params["decay_w2"].astype(jnp.float32)
    packed = jnp.stack(
        [
            du,
            (1.0 - du) * params["bias"],
            dw1,
            (1.0 - dw1) * params["a1"] * q,
            (1.0 - dw1) * params["b1"] * q,
            dw2,
            (1.0 - dw2) * params["a2"] * q,
            (1.0 - dw2) * params["b2"] * q,
        ],
        axis=0,
    ).astype(jnp.float32)                                # (8, N)
    return wt, rec, packed


# ---------------------------------------------------------------------------
# Rollout wrapper: x_seq (T, B, IN), states 4 x (B, N) -> z_seq (T, B, N), final states.
# ---------------------------------------------------------------------------
def efadlif_rollout(params, x_seq, states, *, thr=1.0, q=120.0,
                    batch_tile=None, compute_dtype=jnp.bfloat16):
    u0, z0, w10, w20 = states
    T, B, IN = x_seq.shape
    N = params["weight_1"].shape[0]
    if batch_tile is None:
        batch_tile = B if B <= 128 else _pick_tile(B, (128, 64, 32, 16, 8))
    assert B % batch_tile == 0, "batch must be a multiple of batch_tile"
    TB = batch_tile
    nb = B // TB

    wt, rec, packed = prepare_params(params, q=q, compute_dtype=compute_dtype)

    # Phase 1: time-parallel input projection as one big MXU matmul.
    x2d = x_seq.reshape(T * B, IN).astype(compute_dtype)
    soma_in = input_projection(x2d, wt).reshape(T, B, N)

    thr_arr = jnp.full((1, 1), thr, jnp.float32)

    smem_spec = pl.BlockSpec(memory_space=pltpu.MemorySpace.SMEM)
    # Resident (DMA'd once) operands: constant block index across the whole grid.
    rec_spec = pl.BlockSpec((N, N), lambda b, t: (0, 0))
    p_spec = pl.BlockSpec((8, N), lambda b, t: (0, 0))
    # Per-batch-tile operands: constant across the time axis -> fetched once per tile.
    state_spec = pl.BlockSpec((TB, N), lambda b, t: (b, 0))
    # Streamed per-timestep operands.
    soma_spec = pl.BlockSpec((None, TB, N), lambda b, t: (t, b, 0))
    zseq_spec = pl.BlockSpec((None, TB, N), lambda b, t: (t, b, 0))

    state_sds = jax.ShapeDtypeStruct((B, N), jnp.float32)

    z_seq, u_f, z_f, w1_f, w2_f = pl.pallas_call(
        efadlif_recurrence_kernel,
        grid=(nb, T),
        in_specs=[
            smem_spec,                                    # thr
            soma_spec,                                    # precomputed input projection
            rec_spec, p_spec,                             # recurrent weights + coeffs
            state_spec, state_spec, state_spec, state_spec,  # initial states
        ],
        out_specs=(
            zseq_spec,                                    # z_seq
            state_spec, state_spec, state_spec, state_spec,  # final states (carried)
        ),
        out_shape=(
            jax.ShapeDtypeStruct((T, B, N), jnp.float32),
            state_sds, state_sds, state_sds, state_sds,
        ),
        compiler_params=pltpu.CompilerParams(
            dimension_semantics=("parallel", "arbitrary")),
    )(thr_arr, soma_in, rec, packed, u0, z0, w10, w20)
    return z_seq, (u_f, z_f, w1_f, w2_f)


# ---------------------------------------------------------------------------
# Pure-JAX reference: same prepared (bf16 weight / folded coefficient) params,
# same per-step recurrence (algebraically identical to the PyTorch forward).
# ---------------------------------------------------------------------------
def efadlif_ref_rollout(params, x_seq, states, *, thr=1.0, q=120.0,
                        compute_dtype=jnp.bfloat16):
    wt, rec, packed = prepare_params(params, q=q, compute_dtype=compute_dtype)
    du, bias_eff, dw1, c1a, c1b, dw2, c2a, c2b = packed
    T, B, IN = x_seq.shape
    soma_in = jnp.dot(x_seq.reshape(T * B, IN).astype(compute_dtype), wt,
                      preferred_element_type=jnp.float32).reshape(T, B, -1)

    def step(carry, soma_t):
        u, z, w1, w2 = carry
        soma = soma_t + jnp.dot(z.astype(compute_dtype), rec,
                                preferred_element_type=jnp.float32)
        u_t = du * u + (1.0 - du) * (soma - w1 - w2) + bias_eff
        z_t = (u_t - thr > 0.0).astype(jnp.float32)
        u_t = u_t * (1.0 - z_t)
        w_t1 = dw1 * w1 + c1a * u + c1b * z
        w_t2 = dw2 * w1 + c2a * u + c2b * z     # matches PyTorch: decays w1
        return (u_t, z_t, w_t1, w_t2), z_t

    final, z_seq = jax.lax.scan(step, states, soma_in)
    return z_seq, final


# ---------------------------------------------------------------------------
# Parameter init mirroring EFAdLIF.reset_parameters
# ---------------------------------------------------------------------------
def init_params(key, in_features, n_neurons,
                tau_u_range=(5.0, 25.0), tau_w_range=(30.0, 300.0), dt=1.0):
    ks = jax.random.split(key, 10)
    lim = 1.0 / jnp.sqrt(jnp.float32(in_features))

    def interp_decay(k, lo, hi):
        r = jax.random.uniform(k, (n_neurons,), jnp.float32)
        tau = lo + r * (hi - lo)
        return jnp.exp(-dt / tau)

    return {
        "weight_1": jax.random.uniform(ks[0], (n_neurons, in_features), jnp.float32, -lim, lim),
        "weight_2": jax.random.uniform(ks[1], (n_neurons, in_features), jnp.float32, -lim, lim),
        "bias": jnp.zeros((n_neurons,), jnp.float32),
        "recurrent": jax.nn.initializers.orthogonal()(ks[2], (n_neurons, n_neurons), jnp.float32),
        "a1": jax.random.uniform(ks[3], (n_neurons,), jnp.float32, 0.0, 1.0),
        "a2": jax.random.uniform(ks[4], (n_neurons,), jnp.float32, 0.0, 1.0),
        "b1": jax.random.uniform(ks[5], (n_neurons,), jnp.float32, 0.0, 2.0),
        "b2": jax.random.uniform(ks[6], (n_neurons,), jnp.float32, 0.0, 2.0),
        "decay_u": interp_decay(ks[7], *tau_u_range),
        "decay_w1": interp_decay(ks[8], *tau_w_range),
        "decay_w2": interp_decay(ks[9], *tau_w_range),
    }


if __name__ == "__main__":
    # Small but lane/sublane-aligned demo shapes.
    T, B, IN, N = 8, 16, 128, 128
    key = jax.random.PRNGKey(0)
    k_p, k_x, k_u, k_z, k_w1, k_w2 = jax.random.split(key, 6)

    params = init_params(k_p, IN, N)
    x_seq = jax.random.normal(k_x, (T, B, IN), jnp.float32) * 0.5
    # Non-trivial initial state so every branch of the update is exercised.
    u0 = jax.random.normal(k_u, (B, N), jnp.float32) * 0.5
    z0 = (jax.random.uniform(k_z, (B, N)) > 0.7).astype(jnp.float32)
    w10 = jax.random.normal(k_w1, (B, N), jnp.float32) * 0.1
    w20 = jax.random.normal(k_w2, (B, N), jnp.float32) * 0.1
    states = (u0, z0, w10, w20)

    z_seq, (u_f, z_f, w1_f, w2_f) = efadlif_rollout(
        params, x_seq, states, thr=1.0, q=120.0)
    jax.block_until_ready((z_seq, u_f, z_f, w1_f, w2_f))

    z_ref, (u_r, z_r, w1_r, w2_r) = efadlif_ref_rollout(
        params, x_seq, states, thr=1.0, q=120.0)

    assert z_seq.shape == (T, B, N) and u_f.shape == (B, N)

    # Spike-train agreement. A spike can legitimately flip between two valid
    # evaluation orders only when u_t is within float noise of thr, so require
    # that such flips are (at most) vanishingly rare.
    flip_frac = float(jnp.mean(jnp.abs(z_seq - z_ref)))
    assert flip_frac < 1e-3, f"spike mismatch fraction too large: {flip_frac}"

    # Compare final states on batch rows whose spike trains match everywhere
    # (a boundary flip would legitimately diverge that row's state).
    row_ok = jnp.all(z_seq == z_ref, axis=(0, 2))                 # (B,)
    assert float(jnp.mean(row_ok.astype(jnp.float32))) > 0.9, "too many diverged rows"
    mask = row_ok[:, None].astype(jnp.float32)

    def close(a, b):
        return bool(jnp.allclose(a * mask, b * mask, rtol=2e-3, atol=2e-3))

    assert close(u_f, u_r), "u mismatch"
    assert close(z_f, z_r), "z mismatch"
    assert close(w1_f, w1_r), "w1 mismatch"
    assert close(w2_f, w2_r), "w2 mismatch"

    print("KERNEL_OK")
</pallas_src>

<mosaic_0001>
module attributes {stable_mosaic.version = 11 : i64} {
  func.func @_matmul_kernel(%arg0: i32, %arg1: i32, %arg2: i32, %arg3: memref<128x128xbf16, #tpu.memory_space<vmem>>, %arg4: memref<128x128xbf16, #tpu.memory_space<vmem>>, %arg5: memref<128x128xf32, #tpu.memory_space<vmem>>, %arg6: memref<128x128xf32, #tpu.memory_space<vmem>>) attributes {dimension_semantics = [#tpu.dimension_semantics<parallel>, #tpu.dimension_semantics<parallel>, #tpu.dimension_semantics<arbitrary>], iteration_bounds = array<i64: 1, 1, 1>, scalar_prefetch = 0 : i64, scratch_operands = 1 : i64, tpu.core_type = #tpu.core_type<tc>, window_params = [{transform_indices = @transform_0, window_bounds = array<i64: 128, 128>}, {transform_indices = @transform_1, window_bounds = array<i64: 128, 128>}, {transform_indices = @transform_2, window_bounds = array<i64: 128, 128>}]} {
    %c0_i32 = arith.constant 0 : i32
    %0 = arith.cmpi eq, %arg2, %c0_i32 : i32
    %1 = arith.extui %0 : i1 to i32
    %c0_i32_0 = arith.constant 0 : i32
    %2 = arith.cmpi ne, %1, %c0_i32_0 : i32
    scf.if %2 {
      %cst_10 = arith.constant 0.000000e+00 : f32
      %12 = vector.broadcast %cst_10 : f32 to vector<128x128xf32>
      %c0_11 = arith.constant 0 : index
      %c0_12 = arith.constant 0 : index
      %13 = vector.load %arg6[%c0_11, %c0_12] : memref<128x128xf32, #tpu.memory_space<vmem>>, vector<128x128xf32>
      tpu.vector_store %arg6[%c0_11, %c0_12], %12 {strides = array<i32>} : memref<128x128xf32, #tpu.memory_space<vmem>>, vector<128x128xf32>,
    } else {
    }
    %c0 = arith.constant 0 : index
    %c0_1 = arith.constant 0 : index
    %3 = vector.load %arg6[%c0, %c0_1] : memref<128x128xf32, #tpu.memory_space<vmem>>, vector<128x128xf32>
    %c0_2 = arith.constant 0 : index
    %c0_3 = arith.constant 0 : index
    %4 = vector.load %arg3[%c0_2, %c0_3] : memref<128x128xbf16, #tpu.memory_space<vmem>>, vector<128x128xbf16>
    %c0_4 = arith.constant 0 : index
    %c0_5 = arith.constant 0 : index
    %5 = vector.load %arg4[%c0_4, %c0_5] : memref<128x128xbf16, #tpu.memory_space<vmem>>, vector<128x128xbf16>
    %cst = arith.constant dense<0.000000e+00> : vector<128x128xf32>
    %6 = tpu.matmul %4, %5, %cst {dimension_numbers = #tpu.dot_dimension_numbers<[1], [0], [0], [1], [0, 0, 1, 1], [], []>} : vector<128x128xbf16>, vector<128x128xbf16>, vector<128x128xf32> -> vector<128x128xf32>
    %7 = arith.addf %3, %6 : vector<128x128xf32>
    %c0_6 = arith.constant 0 : index
    %c0_7 = arith.constant 0 : index
    %8 = vector.load %arg6[%c0_6, %c0_7] : memref<128x128xf32, #tpu.memory_space<vmem>>, vector<128x128xf32>
    tpu.vector_store %arg6[%c0_6, %c0_7], %7 {strides = array<i32>} : memref<128x128xf32, #tpu.memory_space<vmem>>, vector<128x128xf32>,
    %c0_i32_8 = arith.constant 0 : i32
    %9 = arith.cmpi eq, %arg2, %c0_i32_8 : i32
    %10 = arith.extui %9 : i1 to i32
    %c0_i32_9 = arith.constant 0 : i32
    %11 = arith.cmpi ne, %10, %c0_i32_9 : i32
    scf.if %11 {
      %c0_10 = arith.constant 0 : index
      %c0_11 = arith.constant 0 : index
      %12 = vector.load %arg6[%c0_10, %c0_11] : memref<128x128xf32, #tpu.memory_space<vmem>>, vector<128x128xf32>
      %c0_12 = arith.constant 0 : index
      %c0_13 = arith.constant 0 : index
      %13 = vector.load %arg5[%c0_12, %c0_13] : memref<128x128xf32, #tpu.memory_space<vmem>>, vector<128x128xf32>
      tpu.vector_store %arg5[%c0_12, %c0_13], %12 {strides = array<i32>} : memref<128x128xf32, #tpu.memory_space<vmem>>, vector<128x128xf32>,
    } else {
    }
    return
  }
  func.func @transform_0(%arg0: i32, %arg1: i32, %arg2: i32) -> (i32, i32) {
    %c0_i32 = arith.constant 0 : i32
    return %arg0, %arg2 : i32, i32
  }
  func.func @transform_1(%arg0: i32, %arg1: i32, %arg2: i32) -> (i32, i32) {
    %c0_i32 = arith.constant 0 : i32
    return %arg2, %arg1 : i32, i32
  }
  func.func @transform_2(%arg0: i32, %arg1: i32, %arg2: i32) -> (i32, i32) {
    %c0_i32 = arith.constant 0 : i32
    return %arg0, %arg1 : i32, i32
  }
}

</mosaic_0001>

<bundles_post_ra>
// kernel: tpu_custom_call.1
= control target key start
LH: loop header
LB: loop body
LE: loop exit
PB: predicated region body
PF: predicated region fallthrough
CT: control target
= control target key end

     0   :  { %7 = vsyncpa [#allocation4], 0  ;;  %s587_s0 = inlined_call_operand.hbm [shape: bf16[128,128], index: 0, kind: input, shape index: {}]   ;;  %s588_s1 = inlined_call_operand.hbm [shape: bf16[128,128], index: 1, kind: input, shape index: {}]   ;;  %s589_s2 = inlined_call_operand.hbm [shape: f32[128,128], index: 2, kind: output, shape index: {}]  }
   0x1   :  { %8 = vsyncpa [#allocation7], 0 }
   0x2   :  { %9 = vsyncpa [#allocation5], 0  ;;  %s556_s9 = smov [#allocation3]  }
   0x3   :  { %s15_s10 = sshll.u32 %s556_s9, 4  ;;  %s16_s10 = int_to_ptr.vmem [resolvable:$true] %s15_s10 }
   0x4   :  { %s498_s11 = scalar_lea.vmem %s16_s10, 1024  ;;  %p503_p1 = scmp.lt.s32.totalorder %s16_s10, %s16_s10 }
   0x5   :  { %p499_p0 = scmp.ne.s32.totalorder %s16_s10, %s498_s11  ;;  %p504_p2 = scmp.lt.s32.totalorder %s498_s11, %s498_s11 }
   0x7   :  { %p505_p3 = por %p504_p2, %p503_p1 }
   0x9   :  { %p506_p4 = pnand %p505_p3, %p499_p0 }
   0xb   :  { %509 = shalt.err (!%p506_p4)
}
   0xc   :  { %s557_s12 = smov 64   ;;  %s558_s13 = smov 4  }
   0xd   :  { %21 = dma.hbm_to_vmem [thread:$0]  %s587_s0, 1024, %s16_s10, [#allocation4], %s557_s12, %s557_s12, %s558_s13  }
   0xe   :  { %s559_s16 = smov [#allocation6]  }
   0xf   :  { %s27_s17 = sshll.u32 %s559_s16, 4  ;;  %s28_s17 = int_to_ptr.vmem [resolvable:$true] %s27_s17 }
  0x10   :  { %s518_s18 = scalar_lea.vmem %s28_s17, 1024  ;;  %p523_p6 = scmp.lt.s32.totalorder %s28_s17, %s28_s17 }
  0x11   :  { %p519_p5 = scmp.ne.s32.totalorder %s28_s17, %s518_s18  ;;  %p524_p7 = scmp.lt.s32.totalorder %s518_s18, %s518_s18 }
  0x13   :  { %p525_p8 = por %p524_p7, %p523_p6 }
  0x15   :  { %p526_p9 = pnand %p525_p8, %p519_p5 }
  0x17   :  { %529 = shalt.err (!%p526_p9)
}
  0x18   :  { %33 = dma.hbm_to_vmem [thread:$0]  %s588_s1, 1024, %s28_s17, [#allocation7], %s557_s12, %s557_s12, %s558_s13  }
  0x19   :  { %550 = dma.done.wait [#allocation4], 1024  }
  0x1a   :  { %551 = vsyncadd [#allocation4], 4294966272 }
  0x1b   :  { %552 = dma.done.wait [#allocation7], 1024  }
  0x1c   :  { %553 = vsyncadd [#allocation7], 4294966272  ;;  %v474_v0 = vld [vmem:[#allocation6 + $0x38] sm:$0xff]   ;;  %v475_v1 = vld [vmem:[#allocation6 + $0x30] sm:$0xff]   ;;  %s560_s0 = smov [#allocation8]  }
  0x1d   :  { %419 = vmatprep.subr.bf16.mxu0 %v474_v0  ;;  %451 = vmatprep.subr.bf16.mxu1 %v474_v0  ;;  %v476_v2 = vld [vmem:[#allocation6 + $0x28] sm:$0xff]   ;;  %v477_v3 = vld [vmem:[#allocation6 + $0x20] sm:$0xff]   ;;  %v478_v6 = vld [vmem:[#allocation6 + $0x18] sm:$0xff]   ;;  %s374_s1 = sshll.u32 %s560_s0, 4  ;;  %s375_s1 = int_to_ptr.vmem [resolvable:$true] %s374_s1 }
  0x1e   :  { %420 = vmatpush3.bf16.msra.mxu0 %v474_v0  ;;  %459 = vmatpush3.bf16.msra.mxu1 %v474_v0  ;;  %v482_v4 = vld [vmem:[#allocation3] sm:$0xff]   ;;  %v479_v7 = vld [vmem:[#allocation6 + $0x10] sm:$0xff]   ;;  %v480_v8 = vld [vmem:[#allocation6 + $0x8] sm:$0xff]   ;;  %s530_s21 = scalar_lea.vmem %s375_s1, 2048  ;;  %p535_p11 = scmp.lt.s32.totalorder %s375_s1, %s375_s1 }
  0x1f   :  { %421 = vmatprep.subr.bf16.mxu0 %v475_v1  ;;  %452 = vmatprep.subr.bf16.mxu1 %v475_v1  ;;  %v483_v5 = vld [vmem:[#allocation3 + $0x20] sm:$0xff]   ;;  %v484_v10 = vld [vmem:[#allocation3 + $0x8] sm:$0xff]   ;;  %v486_v12 = vld [vmem:[#allocation3 + $0x10] sm:$0xff]   ;;  %p531_p10 = scmp.ne.s32.totalorder %s375_s1, %s530_s21  ;;  %p536_p12 = scmp.lt.s32.totalorder %s530_s21, %s530_s21 }
  0x20   :  { %435 = vmatprep.mubr.bf16.mxu0 %v482_v4  ;;  %443 = vmatprep.mubr.bf16.mxu1 %v483_v5  ;;  %v481_v9 = vld [vmem:[#allocation6] sm:$0xff]   ;;  %v485_v11 = vld [vmem:[#allocation3 + $0x28] sm:$0xff]   ;;  %v487_v13 = vld [vmem:[#allocation3 + $0x30] sm:$0xff]  }
  0x21   :  { %v488_v14 = vld [vmem:[#allocation3 + $0x18] sm:$0xff]   ;;  %p537_p13 = por %p536_p12, %p535_p11 }
  0x22   :  { %422 = vmatpush3.bf16.msra.mxu0 %v475_v1  ;;  %460 = vmatpush3.bf16.msra.mxu1 %v475_v1  ;;  %v489_v15 = vld [vmem:[#allocation3 + $0x38] sm:$0xff]  }
  0x23   :  { %423 = vmatprep.subr.bf16.mxu0 %v476_v2  ;;  %453 = vmatprep.subr.bf16.mxu1 %v476_v2  ;;  %p538_p0 = pnand %p537_p13, %p531_p10 }
  0x26   :  { %424 = vmatpush3.bf16.msra.mxu0 %v476_v2  ;;  %461 = vmatpush3.bf16.msra.mxu1 %v476_v2 }
  0x27   :  { %425 = vmatprep.subr.bf16.mxu0 %v477_v3  ;;  %454 = vmatprep.subr.bf16.mxu1 %v477_v3 }
  0x2a   :  { %426 = vmatpush3.bf16.msra.mxu0 %v477_v3  ;;  %462 = vmatpush3.bf16.msra.mxu1 %v477_v3 }
  0x2b   :  { %427 = vmatprep.subr.bf16.mxu0 %v478_v6  ;;  %455 = vmatprep.subr.bf16.mxu1 %v478_v6 }
  0x2e   :  { %428 = vmatpush3.bf16.msra.mxu0 %v478_v6  ;;  %463 = vmatpush3.bf16.msra.mxu1 %v478_v6 }
  0x2f   :  { %429 = vmatprep.subr.bf16.mxu0 %v479_v7  ;;  %456 = vmatprep.subr.bf16.mxu1 %v479_v7 }
  0x32   :  { %430 = vmatpush3.bf16.msra.mxu0 %v479_v7  ;;  %464 = vmatpush3.bf16.msra.mxu1 %v479_v7 }
  0x33   :  { %431 = vmatprep.subr.bf16.mxu0 %v480_v8  ;;  %457 = vmatprep.subr.bf16.mxu1 %v480_v8 }
  0x36   :  { %432 = vmatpush3.bf16.msra.mxu0 %v480_v8  ;;  %465 = vmatpush3.bf16.msra.mxu1 %v480_v8 }
  0x37   :  { %433 = vmatprep.subr.bf16.mxu0 %v481_v9  ;;  %458 = vmatprep.subr.bf16.mxu1 %v481_v9 }
  0x3a   :  { %434 = vmatpush3.bf16.msra.mxu0 %v481_v9  ;;  %466 = vmatpush3.bf16.msra.mxu1 %v481_v9 }
  0x3d   :  { %436 = vmatmul.mubr.bf16.vlgmr.msra.gmra.mxu0 %v484_v10  ;;  %444 = vmatmul.mubr.bf16.vlgmr.msra.gmra.mxu1 %v485_v11 }
  0x3e   :  { %439 = vmatprep.mubr.bf16.mxu0 %v486_v12  ;;  %447 = vmatprep.mubr.bf16.mxu1 %v487_v13 }
  0x45   :  { %440 = vmatmul.mubr.bf16.gmra.mxu0 %v488_v14  ;;  %448 = vmatmul.mubr.bf16.gmra.mxu1 %v489_v15 }
  0xfd   :  { %v437_v16 = vpop.f32.mrf.mxu0  ;;  %v445_v17 = vpop.f32.mrf.mxu1 }
  0xfe   :  { %355 = vst [vmem:[#allocation8 + $0x10] sm:$0xff] %v437_v16  ;;  %363 = vst [vmem:[#allocation8 + $0x50] sm:$0xff] %v445_v17 }
  0xff   :  { %v239_v18 = vpop.f32.mrf.mxu0  ;;  %v271_v19 = vpop.f32.mrf.mxu1 }
 0x100   :  { %353 = vst [vmem:[#allocation8] sm:$0xff] %v239_v18  ;;  %361 = vst [vmem:[#allocation8 + $0x40] sm:$0xff] %v271_v19 }
 0x101   :  { %v438_v20 = vpop.f32.mrf.mxu0  ;;  %v446_v21 = vpop.f32.mrf.mxu1 }
 0x102   :  { %356 = vst [vmem:[#allocation8 + $0x18] sm:$0xff] %v438_v20  ;;  %364 = vst [vmem:[#allocation8 + $0x58] sm:$0xff] %v446_v21 }
 0x103   :  { %v242_v22 = vpop.f32.mrf.mxu0  ;;  %v274_v23 = vpop.f32.mrf.mxu1 }
 0x104   :  { %354 = vst [vmem:[#allocation8 + $0x8] sm:$0xff] %v242_v22  ;;  %362 = vst [vmem:[#allocation8 + $0x48] sm:$0xff] %v274_v23 }
 0x105   :  { %v441_v24 = vpop.f32.mrf.mxu0  ;;  %v449_v25 = vpop.f32.mrf.mxu1 }
 0x106   :  { %359 = vst [vmem:[#allocation8 + $0x30] sm:$0xff] %v441_v24  ;;  %367 = vst [vmem:[#allocation8 + $0x70] sm:$0xff] %v449_v25 }
 0x107   :  { %v255_v26 = vpop.f32.mrf.mxu0  ;;  %v287_v27 = vpop.f32.mrf.mxu1 }
 0x108   :  { %357 = vst [vmem:[#allocation8 + $0x20] sm:$0xff] %v255_v26  ;;  %365 = vst [vmem:[#allocation8 + $0x60] sm:$0xff] %v287_v27 }
 0x109   :  { %v442_v28 = vpop.f32.mrf.mxu0  ;;  %v450_v29 = vpop.f32.mrf.mxu1 }
 0x10a   :  { %360 = vst [vmem:[#allocation8 + $0x38] sm:$0xff] %v442_v28  ;;  %368 = vst [vmem:[#allocation8 + $0x78] sm:$0xff] %v450_v29 }
 0x10b   :  { %v258_v30 = vpop.f32.mrf.mxu0  ;;  %v290_v31 = vpop.f32.mrf.mxu1 }
 0x10c   :  { %358 = vst [vmem:[#allocation8 + $0x28] sm:$0xff] %v258_v30  ;;  %366 = vst [vmem:[#allocation8 + $0x68] sm:$0xff] %v290_v31 }
 0x10d   :  { %541 = shalt.err (!%p538_p0)
}
 0x10e   :  { %s561_s22 = smov 128   ;;  %s562_s23 = smov 8  }
 0x10f   :  { %380 = dma.vmem_to_hbm [thread:$0]  %s375_s1, 2048, %s589_s2, [#allocation5], %s561_s22, %s561_s22, %s562_s23  }
 0x110   :  { %554 = dma.done.wait [#allocation5], 2048  }
 0x111   :  { %555 = vsyncadd [#allocation5], 4294965248 }
 0x112   :  { %384 = vsyncpa [#allocation4], 1 }
 0x113   :  { %385 = vsyncpa [#allocation7], 1 }
 0x114   :  { %386 = vsyncpa [#allocation5], 1 }

</bundles_post_ra>
